<compile_context>
chip_gen: v7x
topology: tpu7x:2x2x1
jax: 0.10.0
libtpu: 0.0.40
codegen_flags: <defaults>
</compile_context>

<pallas_src>
import math

import jax
import jax.numpy as jnp
from jax.experimental import pallas as pl
from jax.experimental.pallas import tpu as pltpu


# ----------------------------------------------------------------------------
# Configuration constants (mirror ModelConfig defaults)
# ----------------------------------------------------------------------------
N_IMAGES = 4
N_GAUSSIAN_FEATURE_DIMS = 64
N_APPEARANCE_EMB_DIMS = 128
N_TRANSIENT_EMB_DIMS = 128
N_NEURONS = 64
UV_N_LEVELS = 8
UV_BASE_RES = 16
UV_PER_LEVEL_SCALE = 1.405
UV_FEATS_PER_LEVEL = 2                            # tcnn DenseGrid default
UV_OUT_DIMS = UV_N_LEVELS * UV_FEATS_PER_LEVEL    # 16

D_IN = N_GAUSSIAN_FEATURE_DIMS                    # common (padded) feature width
D_OUT = 4                                         # narrow padded output width (3 rgb / 1 vis)


def _round_up(x, m):
    return ((x + m - 1) // m) * m


# ----------------------------------------------------------------------------
# Fused Pallas kernel: per-tile 3-layer MLP, weight set selected per segment
#   y = sigmoid(relu(x@W1f + bias1[img])@W2 + b2)@W3 + b3)
# bias1[img] already contains the embedding contribution (emb @ W1e + b1).
# ----------------------------------------------------------------------------
def _fused_mlp_kernel(seg_ref, app_ref,           # scalar prefetch (index_map only)
                      x_ref, bias1_ref,
                      w1_ref, w2_ref, b2_ref, w3_ref, b3_ref,
                      o_ref):
    del seg_ref, app_ref
    x = x_ref[...]                                                    # (tm, 64) bf16
    h = jnp.dot(x, w1_ref[0], preferred_element_type=jnp.float32)
    h = jnp.maximum(h + bias1_ref[0], 0.0).astype(jnp.bfloat16)       # (tm, 64)
    h = jnp.dot(h, w2_ref[0], preferred_element_type=jnp.float32)
    h = jnp.maximum(h + b2_ref[0], 0.0).astype(jnp.bfloat16)          # (tm, 64)
    y = jnp.dot(h, w3_ref[0], preferred_element_type=jnp.float32) + b3_ref[0]
    o_ref[...] = jax.nn.sigmoid(y).astype(o_ref.dtype)                # (tm, 4)


def fused_mlp_pallas(app_idx, x_app, x_vis_feat, fused, *, tm_max=2048):
    """Run appearance (segment 0) and visibility (segment 1) MLPs in one call.

    app_idx:     (1,) int32 image index
    x_app:       (n_app, 64)  gaussian features (any float dtype)
    x_vis_feat:  (n_vis, 16)  uv encoding features
    fused:       packed weight dict (see make_params)
    Returns (rgb (n_app, 3) f32, vis (n_vis,) f32).
    """
    d_in = fused["w1"].shape[-2]
    d_out = fused["w3"].shape[-1]
    n_app, n_vis = x_app.shape[0], x_vis_feat.shape[0]

    tm = min(tm_max, _round_up(max(n_app, n_vis), 16))
    t_app = -(-n_app // tm)
    t_vis = -(-n_vis // tm)
    n_tiles = t_app + t_vis
    n_total = n_tiles * tm

    # bf16 inputs, rows padded per segment to a multiple of tm, columns to d_in.
    x_app_p = jnp.pad(x_app.astype(jnp.bfloat16),
                      ((0, t_app * tm - n_app), (0, d_in - x_app.shape[1])))
    x_vis_p = jnp.pad(x_vis_feat.astype(jnp.bfloat16),
                      ((0, t_vis * tm - n_vis), (0, d_in - x_vis_feat.shape[1])))
    x_all = jnp.concatenate([x_app_p, x_vis_p], axis=0)               # (n_total, 64) bf16

    seg_ids = jnp.concatenate([jnp.zeros((t_app,), jnp.int32),
                               jnp.ones((t_vis,), jnp.int32)])

    weight_bytes = sum(int(v.size) * v.dtype.itemsize for v in fused.values())
    cost = pl.CostEstimate(
        flops=2 * n_total * (d_in * N_NEURONS + N_NEURONS * N_NEURONS
                             + N_NEURONS * d_out),
        transcendentals=n_total * d_out,
        bytes_accessed=n_total * (d_in * 2 + d_out * 4) + weight_bytes)

    n_img = N_IMAGES

    out = pl.pallas_call(
        _fused_mlp_kernel,
        out_shape=jax.ShapeDtypeStruct((n_total, d_out), jnp.float32),
        grid_spec=pltpu.PrefetchScalarGridSpec(
            num_scalar_prefetch=2,
            grid=(n_tiles,),
            in_specs=[
                # features
                pl.BlockSpec((tm, d_in), lambda i, seg, app: (i, 0)),
                # per-(network, image) precomputed layer-1 bias (emb@W1e + b1)
                pl.BlockSpec((1, 1, N_NEURONS),
                             lambda i, seg, app: (seg[i] * n_img + app[0], 0, 0)),
                # per-network weights / biases
                pl.BlockSpec((1, d_in, N_NEURONS), lambda i, seg, app: (seg[i], 0, 0)),
                pl.BlockSpec((1, N_NEURONS, N_NEURONS), lambda i, seg, app: (seg[i], 0, 0)),
                pl.BlockSpec((1, 1, N_NEURONS), lambda i, seg, app: (seg[i], 0, 0)),
                pl.BlockSpec((1, N_NEURONS, d_out), lambda i, seg, app: (seg[i], 0, 0)),
                pl.BlockSpec((1, 1, d_out), lambda i, seg, app: (seg[i], 0, 0)),
            ],
            out_specs=pl.BlockSpec((tm, d_out), lambda i, seg, app: (i, 0)),
        ),
        compiler_params=pltpu.CompilerParams(
            dimension_semantics=("parallel",)),
        cost_estimate=cost,
    )(seg_ids, app_idx, x_all,
      fused["bias1"], fused["w1"], fused["w2"], fused["b2"],
      fused["w3"], fused["b3"])

    rgb = out[:n_app, :3]
    vis = out[t_app * tm: t_app * tm + n_vis, 0]
    return rgb, vis


# ----------------------------------------------------------------------------
# Parameter construction (deterministic, synthetic)
# ----------------------------------------------------------------------------
def _linear_params(key, d_in, d_out):
    kw, kb = jax.random.split(key)
    scale = 1.0 / math.sqrt(d_in)
    w = jax.random.uniform(kw, (d_in, d_out), jnp.float32, -scale, scale)
    b = jax.random.uniform(kb, (1, d_out), jnp.float32, -scale, scale)
    return w, b


def make_params(key):
    keys = jax.random.split(key, 8)
    params = {}
    # embeddings (nn.Embedding default init ~ N(0,1))
    app_emb = jax.random.normal(keys[0], (N_IMAGES, N_APPEARANCE_EMB_DIMS), jnp.float32)
    tra_emb = jax.random.normal(keys[1], (N_IMAGES, N_TRANSIENT_EMB_DIMS), jnp.float32)
    params["appearance_embedding"] = app_emb
    params["transient_embedding"] = tra_emb

    # appearance network: (64 + 128) -> 64 -> 64 -> 3
    aw1, ab1 = _linear_params(keys[2],
                              N_GAUSSIAN_FEATURE_DIMS + N_APPEARANCE_EMB_DIMS,
                              N_NEURONS)
    aw2, ab2 = _linear_params(keys[3], N_NEURONS, N_NEURONS)
    aw3, ab3 = _linear_params(keys[4], N_NEURONS, 3)

    # visibility network: (16 + 128) -> 64 -> 64 -> 1
    vw1, vb1 = _linear_params(keys[5],
                              UV_OUT_DIMS + N_TRANSIENT_EMB_DIMS, N_NEURONS)
    vw2, vb2 = _linear_params(keys[6], N_NEURONS, N_NEURONS)
    vw3, vb3 = _linear_params(keys[7], N_NEURONS, 1)

    # ---- pack fused kernel operands ----------------------------------------
    # split layer-1 weight into feature part / embedding part
    aw1f, aw1e = aw1[:N_GAUSSIAN_FEATURE_DIMS], aw1[N_GAUSSIAN_FEATURE_DIMS:]
    vw1f, vw1e = vw1[:UV_OUT_DIMS], vw1[UV_OUT_DIMS:]
    # pad visibility feature weight rows 16 -> 64 (zero rows match zero-padded uv cols)
    vw1f_pad = jnp.zeros((D_IN, N_NEURONS), jnp.float32).at[:UV_OUT_DIMS].set(vw1f)

    # per-(network, image) layer-1 bias table: emb @ W1e + b1  -> f32
    app_bias1 = app_emb @ aw1e + ab1                    # (n_images, 64)
    vis_bias1 = tra_emb @ vw1e + vb1                    # (n_images, 64)
    bias1 = jnp.stack([app_bias1, vis_bias1]).reshape(2 * N_IMAGES, 1, N_NEURONS)

    # layer-3 padded to the narrow common output width D_OUT
    aw3p = jnp.zeros((N_NEURONS, D_OUT), jnp.float32).at[:, :3].set(aw3)
    ab3p = jnp.zeros((1, D_OUT), jnp.float32).at[:, :3].set(ab3)
    vw3p = jnp.zeros((N_NEURONS, D_OUT), jnp.float32).at[:, :1].set(vw3)
    vb3p = jnp.zeros((1, D_OUT), jnp.float32).at[:, :1].set(vb3)

    params["fused"] = {
        "bias1": bias1,                                            # (8,1,64) f32
        "w1": jnp.stack([aw1f, vw1f_pad]).astype(jnp.bfloat16),    # (2,64,64)
        "w2": jnp.stack([aw2, vw2]).astype(jnp.bfloat16),          # (2,64,64)
        "b2": jnp.stack([ab2, vb2]),                               # (2,1,64) f32
        "w3": jnp.stack([aw3p, vw3p]).astype(jnp.bfloat16),        # (2,64,4)
        "b3": jnp.stack([ab3p, vb3p]),                             # (2,1,4) f32
    }
    return params


def make_uv_grids(image_idx):
    """Per-image multi-resolution dense feature grids (tcnn DenseGrid analogue).
    Grid features are init uniform(-1e-4, 1e-4), seeded by the image index."""
    resolutions = [int(round(UV_BASE_RES * UV_PER_LEVEL_SCALE ** l))
                   for l in range(UV_N_LEVELS)]
    key = jax.random.PRNGKey(image_idx)        # mirrors tcnn `seed=i`
    grids = []
    for res in resolutions:
        key, sub = jax.random.split(key)
        grids.append(jax.random.uniform(
            sub, (res * res, UV_FEATS_PER_LEVEL), jnp.float32, -1e-4, 1e-4))
    return grids, resolutions


# ----------------------------------------------------------------------------
# Glue: dense-grid encoding (bilinear interpolation of learned grid features)
# ----------------------------------------------------------------------------
# TODO(synk): bilinear corner/offset convention approximates (not bit-matches)
#             tcnn's DenseGrid; the data-dependent grid gather stays in JAX
#             (fusing the gather into the Pallas kernel is a possible follow-up).
def dense_grid_encode(uv, grids, resolutions):
    feats = []
    for grid, res in zip(grids, resolutions):
        pos = uv * (res - 1)
        p0 = jnp.clip(jnp.floor(pos).astype(jnp.int32), 0, res - 2)
        frac = pos - p0.astype(uv.dtype)
        x0, y0 = p0[:, 0], p0[:, 1]
        fx, fy = frac[:, 0:1], frac[:, 1:2]

        def g(xi, yi):
            return grid[xi + yi * res]         # (n, F)  -- square grids only

        f = (g(x0, y0) * (1 - fx) * (1 - fy)
             + g(x0 + 1, y0) * fx * (1 - fy)
             + g(x0, y0 + 1) * (1 - fx) * fy
             + g(x0 + 1, y0 + 1) * fx * fy)
        feats.append(f)
    return jnp.concatenate(feats, axis=-1)     # (n, 16)


# ----------------------------------------------------------------------------
# Model forward (appearance + visibility, single fused pallas_call)
# ----------------------------------------------------------------------------
def model_forward(params, width, height, gaussian_features, appearance,
                  view_dirs, appearance_idx):
    # is_view_dependent is False by default -> view_dirs unused.
    del view_dirs
    app_idx = appearance.reshape((-1,)).astype(jnp.int32)

    # visibility uv features (plain JAX; data-dependent gather)
    gx, gy = jnp.meshgrid(jnp.arange(width, dtype=jnp.float32),
                          jnp.arange(height, dtype=jnp.float32),
                          indexing="xy")                                # (H, W)
    grid_normalized = jnp.concatenate(
        [gx[..., None] / (width - 1), gy[..., None] / (height - 1)], axis=-1)
    uv = grid_normalized.reshape((-1, 2))                               # (H*W, 2)

    # TODO(synk): appearance_idx must be a static Python int (tcnn module-list
    #             selection via appearance.item()); not jit-traceable as-is.
    grids, resolutions = make_uv_grids(appearance_idx)
    uv_feat = dense_grid_encode(uv, grids, resolutions)                 # (H*W, 16)

    rgb, vis = fused_mlp_pallas(app_idx, gaussian_features, uv_feat,
                                params["fused"])
    return rgb, vis.reshape(grid_normalized.shape[:-1])                 # (n,3), (H,W)


# ----------------------------------------------------------------------------
if __name__ == "__main__":
    key = jax.random.PRNGKey(0)
    k_params, k_feat, k_dirs = jax.random.split(key, 3)

    params = make_params(k_params)

    N_GAUSSIANS = 256
    WIDTH, HEIGHT = 16, 16
    appearance_idx = 1                                         # appearance.item()
    appearance = jnp.array([appearance_idx], dtype=jnp.int32)

    gaussian_features = jax.random.normal(
        k_feat, (N_GAUSSIANS, N_GAUSSIAN_FEATURE_DIMS), jnp.float32)
    view_dirs = jax.random.normal(k_dirs, (N_GAUSSIANS, 3), jnp.float32)

    rgb, visibility = model_forward(params, WIDTH, HEIGHT, gaussian_features,
                                    appearance, view_dirs, appearance_idx)
    jax.block_until_ready((rgb, visibility))

    assert rgb.shape == (N_GAUSSIANS, 3)
    assert visibility.shape == (HEIGHT, WIDTH)
    assert bool(jnp.all((rgb >= 0) & (rgb <= 1)))
    assert bool(jnp.all((visibility >= 0) & (visibility <= 1)))
    assert bool(jnp.all(jnp.isfinite(rgb))) and bool(jnp.all(jnp.isfinite(visibility)))
    print("KERNEL_OK")
</pallas_src>

<mosaic_0001>
module attributes {stable_mosaic.version = 11 : i64} {
  func.func @_fused_mlp_kernel(%arg0: i32, %arg1: memref<2xi32, #tpu.memory_space<smem>>, %arg2: memref<1xi32, #tpu.memory_space<smem>>, %arg3: memref<256x64xbf16, #tpu.memory_space<vmem>>, %arg4: memref<1x1x64xf32, #tpu.memory_space<vmem>>, %arg5: memref<1x64x64xbf16, #tpu.memory_space<vmem>>, %arg6: memref<1x64x64xbf16, #tpu.memory_space<vmem>>, %arg7: memref<1x1x64xf32, #tpu.memory_space<vmem>>, %arg8: memref<1x64x4xbf16, #tpu.memory_space<vmem>>, %arg9: memref<1x1x4xf32, #tpu.memory_space<vmem>>, %arg10: memref<256x4xf32, #tpu.memory_space<vmem>>) attributes {dimension_semantics = [#tpu.dimension_semantics<parallel>], iteration_bounds = array<i64: 2>, scalar_prefetch = 2 : i64, scratch_operands = 0 : i64, tpu.core_type = #tpu.core_type<tc>, window_params = [{transform_indices = @transform_0, window_bounds = array<i64: 256, 64>}, {transform_indices = @transform_1, window_bounds = array<i64: 1, 1, 64>}, {transform_indices = @transform_2, window_bounds = array<i64: 1, 64, 64>}, {transform_indices = @transform_3, window_bounds = array<i64: 1, 64, 64>}, {transform_indices = @transform_4, window_bounds = array<i64: 1, 1, 64>}, {transform_indices = @transform_5, window_bounds = array<i64: 1, 64, 4>}, {transform_indices = @transform_6, window_bounds = array<i64: 1, 1, 4>}, {transform_indices = @transform_7, window_bounds = array<i64: 256, 4>}]} {
    %c0 = arith.constant 0 : index
    %c0_0 = arith.constant 0 : index
    %0 = vector.load %arg3[%c0, %c0_0] : memref<256x64xbf16, #tpu.memory_space<vmem>>, vector<256x64xbf16>
    %c0_1 = arith.constant 0 : index
    %c0_2 = arith.constant 0 : index
    %c0_3 = arith.constant 0 : index
    %1 = vector.load %arg5[%c0_1, %c0_2, %c0_3] : memref<1x64x64xbf16, #tpu.memory_space<vmem>>, vector<1x64x64xbf16>
    %2 = vector.shape_cast %1 : vector<1x64x64xbf16> to vector<64x64xbf16>
    %cst = arith.constant dense<0.000000e+00> : vector<256x64xf32>
    %3 = tpu.matmul %0, %2, %cst {dimension_numbers = #tpu.dot_dimension_numbers<[1], [0], [0], [1], [0, 0, 1, 1], [], []>} : vector<256x64xbf16>, vector<64x64xbf16>, vector<256x64xf32> -> vector<256x64xf32>
    %c0_4 = arith.constant 0 : index
    %c0_5 = arith.constant 0 : index
    %c0_6 = arith.constant 0 : index
    %4 = vector.load %arg4[%c0_4, %c0_5, %c0_6] : memref<1x1x64xf32, #tpu.memory_space<vmem>>, vector<1x1x64xf32>
    %5 = vector.shape_cast %4 : vector<1x1x64xf32> to vector<1x64xf32>
    %6 = vector.broadcast %5 : vector<1x64xf32> to vector<256x64xf32>
    %7 = arith.addf %3, %6 : vector<256x64xf32>
    %cst_7 = arith.constant 0.000000e+00 : f32
    %8 = vector.broadcast %cst_7 : f32 to vector<256x64xf32>
    %9 = arith.maximumf %7, %8 : vector<256x64xf32>
    %10 = arith.truncf %9 : vector<256x64xf32> to vector<256x64xbf16>
    %c0_8 = arith.constant 0 : index
    %c0_9 = arith.constant 0 : index
    %c0_10 = arith.constant 0 : index
    %11 = vector.load %arg6[%c0_8, %c0_9, %c0_10] : memref<1x64x64xbf16, #tpu.memory_space<vmem>>, vector<1x64x64xbf16>
    %12 = vector.shape_cast %11 : vector<1x64x64xbf16> to vector<64x64xbf16>
    %cst_11 = arith.constant dense<0.000000e+00> : vector<256x64xf32>
    %13 = tpu.matmul %10, %12, %cst_11 {dimension_numbers = #tpu.dot_dimension_numbers<[1], [0], [0], [1], [0, 0, 1, 1], [], []>} : vector<256x64xbf16>, vector<64x64xbf16>, vector<256x64xf32> -> vector<256x64xf32>
    %c0_12 = arith.constant 0 : index
    %c0_13 = arith.constant 0 : index
    %c0_14 = arith.constant 0 : index
    %14 = vector.load %arg7[%c0_12, %c0_13, %c0_14] : memref<1x1x64xf32, #tpu.memory_space<vmem>>, vector<1x1x64xf32>
    %15 = vector.shape_cast %14 : vector<1x1x64xf32> to vector<1x64xf32>
    %16 = vector.broadcast %15 : vector<1x64xf32> to vector<256x64xf32>
    %17 = arith.addf %13, %16 : vector<256x64xf32>
    %cst_15 = arith.constant 0.000000e+00 : f32
    %18 = vector.broadcast %cst_15 : f32 to vector<256x64xf32>
    %19 = arith.maximumf %17, %18 : vector<256x64xf32>
    %20 = arith.truncf %19 : vector<256x64xf32> to vector<256x64xbf16>
    %c0_16 = arith.constant 0 : index
    %c0_17 = arith.constant 0 : index
    %c0_18 = arith.constant 0 : index
    %21 = vector.load %arg8[%c0_16, %c0_17, %c0_18] : memref<1x64x4xbf16, #tpu.memory_space<vmem>>, vector<1x64x4xbf16>
    %22 = vector.shape_cast %21 : vector<1x64x4xbf16> to vector<64x4xbf16>
    %cst_19 = arith.constant dense<0.000000e+00> : vector<256x4xf32>
    %23 = tpu.matmul %20, %22, %cst_19 {dimension_numbers = #tpu.dot_dimension_numbers<[1], [0], [0], [1], [0, 0, 1, 1], [], []>} : vector<256x64xbf16>, vector<64x4xbf16>, vector<256x4xf32> -> vector<256x4xf32>
    %c0_20 = arith.constant 0 : index
    %c0_21 = arith.constant 0 : index
    %c0_22 = arith.constant 0 : index
    %24 = vector.load %arg9[%c0_20, %c0_21, %c0_22] : memref<1x1x4xf32, #tpu.memory_space<vmem>>, vector<1x1x4xf32>
    %25 = vector.shape_cast %24 : vector<1x1x4xf32> to vector<1x4xf32>
    %26 = vector.broadcast %25 : vector<1x4xf32> to vector<256x4xf32>
    %27 = arith.addf %23, %26 : vector<256x4xf32>
    %28 = arith.negf %27 : vector<256x4xf32>
    %29 = math.exp %28 : vector<256x4xf32>
    %cst_23 = arith.constant 1.000000e+00 : f32
    %30 = vector.broadcast %cst_23 : f32 to vector<256x4xf32>
    %31 = arith.addf %30, %29 : vector<256x4xf32>
    %32 = arith.divf %30, %31 : vector<256x4xf32>
    %c0_24 = arith.constant 0 : index
    %c0_25 = arith.constant 0 : index
    %33 = vector.load %arg10[%c0_24, %c0_25] : memref<256x4xf32, #tpu.memory_space<vmem>>, vector<256x4xf32>
    tpu.vector_store %arg10[%c0_24, %c0_25], %32 {strides = array<i32>} : memref<256x4xf32, #tpu.memory_space<vmem>>, vector<256x4xf32>,
    return
  }
  func.func @transform_0(%arg0: i32, %arg1: memref<2xi32, #tpu.memory_space<smem>>, %arg2: memref<1xi32, #tpu.memory_space<smem>>) -> (i32, i32) {
    %c0_i32 = arith.constant 0 : i32
    %c0_i32_0 = arith.constant 0 : i32
    return %arg0, %c0_i32 : i32, i32
  }
  func.func @transform_1(%arg0: i32, %arg1: memref<2xi32, #tpu.memory_space<smem>>, %arg2: memref<1xi32, #tpu.memory_space<smem>>) -> (i32, i32, i32) {
    %0 = arith.index_cast %arg0 : i32 to index
    %1 = memref.load %arg1[%0] : memref<2xi32, #tpu.memory_space<smem>>
    %c4_i32 = arith.constant 4 : i32
    %2 = arith.muli %1, %c4_i32 : i32
    %c0 = arith.constant 0 : index
    %3 = memref.load %arg2[%c0] : memref<1xi32, #tpu.memory_space<smem>>
    %4 = arith.addi %2, %3 : i32
    %c0_i32 = arith.constant 0 : i32
    %c0_i32_0 = arith.constant 0 : i32
    %c0_i32_1 = arith.constant 0 : i32
    return %4, %c0_i32, %c0_i32_0 : i32, i32, i32
  }
  func.func @transform_2(%arg0: i32, %arg1: memref<2xi32, #tpu.memory_space<smem>>, %arg2: memref<1xi32, #tpu.memory_space<smem>>) -> (i32, i32, i32) {
    %0 = arith.index_cast %arg0 : i32 to index
    %1 = memref.load %arg1[%0] : memref<2xi32, #tpu.memory_space<smem>>
    %c0_i32 = arith.constant 0 : i32
    %c0_i32_0 = arith.constant 0 : i32
    %c0_i32_1 = arith.constant 0 : i32
    return %1, %c0_i32, %c0_i32_0 : i32, i32, i32
  }
  func.func @transform_3(%arg0: i32, %arg1: memref<2xi32, #tpu.memory_space<smem>>, %arg2: memref<1xi32, #tpu.memory_space<smem>>) -> (i32, i32, i32) {
    %0 = arith.index_cast %arg0 : i32 to index
    %1 = memref.load %arg1[%0] : memref<2xi32, #tpu.memory_space<smem>>
    %c0_i32 = arith.constant 0 : i32
    %c0_i32_0 = arith.constant 0 : i32
    %c0_i32_1 = arith.constant 0 : i32
    return %1, %c0_i32, %c0_i32_0 : i32, i32, i32
  }
  func.func @transform_4(%arg0: i32, %arg1: memref<2xi32, #tpu.memory_space<smem>>, %arg2: memref<1xi32, #tpu.memory_space<smem>>) -> (i32, i32, i32) {
    %0 = arith.index_cast %arg0 : i32 to index
    %1 = memref.load %arg1[%0] : memref<2xi32, #tpu.memory_space<smem>>
    %c0_i32 = arith.constant 0 : i32
    %c0_i32_0 = arith.constant 0 : i32
    %c0_i32_1 = arith.constant 0 : i32
    return %1, %c0_i32, %c0_i32_0 : i32, i32, i32
  }
  func.func @transform_5(%arg0: i32, %arg1: memref<2xi32, #tpu.memory_space<smem>>, %arg2: memref<1xi32, #tpu.memory_space<smem>>) -> (i32, i32, i32) {
    %0 = arith.index_cast %arg0 : i32 to index
    %1 = memref.load %arg1[%0] : memref<2xi32, #tpu.memory_space<smem>>
    %c0_i32 = arith.constant 0 : i32
    %c0_i32_0 = arith.constant 0 : i32
    %c0_i32_1 = arith.constant 0 : i32
    return %1, %c0_i32, %c0_i32_0 : i32, i32, i32
  }
  func.func @transform_6(%arg0: i32, %arg1: memref<2xi32, #tpu.memory_space<smem>>, %arg2: memref<1xi32, #tpu.memory_space<smem>>) -> (i32, i32, i32) {
    %0 = arith.index_cast %arg0 : i32 to index
    %1 = memref.load %arg1[%0] : memref<2xi32, #tpu.memory_space<smem>>
    %c0_i32 = arith.constant 0 : i32
    %c0_i32_0 = arith.constant 0 : i32
    %c0_i32_1 = arith.constant 0 : i32
    return %1, %c0_i32, %c0_i32_0 : i32, i32, i32
  }
  func.func @transform_7(%arg0: i32, %arg1: memref<2xi32, #tpu.memory_space<smem>>, %arg2: memref<1xi32, #tpu.memory_space<smem>>) -> (i32, i32) {
    %c0_i32 = arith.constant 0 : i32
    %c0_i32_0 = arith.constant 0 : i32
    return %arg0, %c0_i32 : i32, i32
  }
}

</mosaic_0001>

<bundles_post_ra>
// kernel: tpu_custom_call.1
= control target key start
LH: loop header
LB: loop body
LE: loop exit
PB: predicated region body
PF: predicated region fallthrough
CT: control target
= control target key end

     0   :  { %s2626_s0 = inlined_call_operand.vmem [shape: s32[2], index: 0, kind: input, shape index: {}]   ;;  %s2627_s1 = inlined_call_operand.<no memory space> [shape: s32[1], index: 1, kind: input, shape index: {}]   ;;  %s2628_s2 = inlined_call_operand.vmem [shape: bf16[512,64], index: 2, kind: input, shape index: {}]   ;;  %s2629_s3 = inlined_call_operand.vmem [shape: f32[8,1,64], index: 3, kind: input, shape index: {}]   ;;  %s2630_s4 = inlined_call_operand.vmem [shape: bf16[2,64,64], index: 4, kind: input, shape index: {}]   ;;  %s2631_s5 = inlined_call_operand.vmem [shape: bf16[2,64,64], index: 5, kind: input, shape index: {}]   ;;  %s2632_s6 = inlined_call_operand.vmem [shape: f32[2,1,64], index: 6, kind: input, shape index: {}]   ;;  %s2633_s7 = inlined_call_operand.vmem [shape: bf16[2,64,4], index: 7, kind: input, shape index: {}]   ;;  %s2634_s8 = inlined_call_operand.vmem [shape: f32[2,1,4], index: 8, kind: input, shape index: {}]   ;;  %s2635_s9 = inlined_call_operand.vmem [shape: f32[512,4], index: 9, kind: output, shape index: {}]  }
   0x1   :  { %s14_s11 = sshll.u32 %s2626_s0, 4  ;;  %18 = sst [smem:[#allocation4]] %s2627_s1  ;;  %s15_s11 = int_to_ptr.vmem [resolvable:$true] %s14_s11 }
   0x2   :  { %s2241_s14 = scalar_lea.vmem %s15_s11, 16  ;;  %p2246_p1 = scmp.lt.s32.totalorder %s15_s11, %s15_s11 }
   0x3   :  { %p2242_p0 = scmp.ne.s32.totalorder %s15_s11, %s2241_s14  ;;  %p2247_p2 = scmp.lt.s32.totalorder %s2241_s14, %s2241_s14 }
   0x5   :  { %p2248_p3 = por %p2247_p2, %p2246_p1 }
   0x7   :  { %p2249_p4 = pnand %p2248_p3, %p2242_p0 }
   0x9   :  { %2252 = shalt.err (!%p2249_p4)  }
   0xa   :  { %s2263_s15 = smov [#allocation3]  }
   0xb   :  { %17 = dma.vmem_to_smem %s15_s11, 16, %s2263_s15, [#allocation2] }
   0xc   :  { %2257 = dma.done.wait [#allocation2], 16 }
   0xd   :  { %2258 = vsyncadd [#allocation2], 4294967280 }
   0xe   :  { %20 = sfence }
   0xf   :  { %s2320_s16 = smov 0  }
  0x10 LB: > { %s2326_s0 = sadd.s32 4294967295, %s2261_s16   ;;  %p1760_p5 = scmp.ge.s32.totalorder %s2261_s16, 1  ;;  %s2261_s16 = sphi %s2320_s16, %s26_s16  }
  0x11   : > { %p337_p6 = scmp.lt.s32.totalorder %s2261_s16, 3 }
  0x13   : > { %p338_p7 = pnand %p1760_p5, %p337_p6 }
  0x14   : > { %s419_s1 = sld [smem:[#allocation3 + %s2326_s0]] (!%p338_p7)  ;;  %s1761_s17 = sshll.u32 (!%p338_p7), %s2326_s0, 5  ;;  %vm608_vm0 = vcmask (!%p338_p7), 523264   ;;  %vm1602_vm1 = vcmask (!%p338_p7), 31744  }
  0x15   : > { %341 = sbr.rel (%p338_p7) target bundleno = 796 (0x31c), region = 48  ;;  %p403_p8 = scmp.lt.s32.totalorder (!%p338_p7), %s1761_s17, 63 }
  0x16   : > { %s426_s19 = sld [smem:[#allocation3 + %s2326_s0]] (!%p338_p7) }
  0x17   : > { %s438_s10 = sld [smem:[#allocation3 + %s2326_s0]] (!%p338_p7) }
  0x18   : > { %s408_s15 = sld [smem:[#allocation3 + %s2326_s0]] (!%p338_p7) }
  0x1a   : > { %p420_p9 = scmp.lt.s32.totalorder (!%p338_p7), %s419_s1, 1 }
  0x1c   : > { %s2637_s17 = smov (!%p403_p8, %s1761_s17), 63  ;;  %s2639_s1 = smov (!%p420_p9, %s419_s1), 1 }
  0x1d   : > { %s1762_s18 = sshll.u32 %s2637_s17, 2  ;;  %s1885_s23 = sshll.u32 %s2639_s1, 5 }
  0x1e   : > { %s2339_s22 = scalar_lea.vmem %s2628_s2, %s1762_s18  ;;  %s424_s26 = scalar_lea.vmem %s2630_s4, %s1885_s23 }
  0x1f   : > { %v2089_v0 = vld [vmem:[%s2339_s22] sm:$0xff]   ;;  %v2086_v2 = vld [vmem:[%s424_s26 + $0x8] sm:$0xff]   ;;  %p427_p10 = scmp.lt.s32.totalorder %s426_s19, 1  ;;  %v2087_v3 = vld [vmem:[%s424_s26 + $0x10] sm:$0xff]   ;;  %p439_p11 = scmp.lt.s32.totalorder %s438_s10, 1 }
  0x20   : > { %1956 = vmatprep.mubr.msk.bf16.mxu0 %vm608_vm0, %v2089_v0  ;;  %v2085_v1 = vld [vmem:[%s424_s26] sm:$0xff]   ;;  %v2088_v5 = vld [vmem:[%s424_s26 + $0x18] sm:$0xff]   ;;  %v2090_v6 = vld [vmem:[%s2339_s22 + $0x8] sm:$0xff]   ;;  %s410_s1 = sld [smem:[#allocation4]]  ;;  %s1763_s18 = sshll.u32 %s408_s15, 2 }
  0x21   : > { %1948 = vmatprep.subr.bf16.mxu0 %v2085_v1  ;;  %2068 = vmatprep.subr.bf16.mxu1 %v2085_v1  ;;  %s2641_s19 = smov (!%p427_p10, %s426_s19), 1  ;;  %v2097_v4 = vld [vmem:[%s2339_s22 + $0x40] sm:$0xff]   ;;  %v2091_v7 = vld [vmem:[%s2339_s22 + $0x10] sm:$0xff]   ;;  %v2098_v8 = vld [vmem:[%s2339_s22 + $0x48] sm:$0xff]   ;;  %s2643_s10 = smov (!%p439_p11, %s438_s10), 1 }
  0x22   : > { %1949 = vmatpush3.bf16.msra.mxu0 %v2085_v1  ;;  %2072 = vmatpush3.bf16.msra.mxu1 %v2085_v1  ;;  %s1886_s27 = sshll.u32 %s2641_s19, 5  ;;  %v2099_v9 = vld [vmem:[%s2339_s22 + $0x50] sm:$0xff]   ;;  %v2092_v13 = vld [vmem:[%s2339_s22 + $0x18] sm:$0xff]   ;;  %v2093_v15 = vld [vmem:[%s2339_s22 + $0x20] sm:$0xff]   ;;  %s1887_s11 = sshll.u32 %s2643_s10, 5 }
  0x23   : > { %1950 = vmatprep.subr.bf16.mxu0 %v2086_v2  ;;  %2069 = vmatprep.subr.bf16.mxu1 %v2086_v2  ;;  %s2352_s30 = scalar_lea.vmem %s2631_s5, %s1886_s27  ;;  %v2100_v14 = vld [vmem:[%s2339_s22 + $0x58] sm:$0xff]   ;;  %v2101_v16 = vld [vmem:[%s2339_s22 + $0x60] sm:$0xff]   ;;  %v2094_v17 = vld [vmem:[%s2339_s22 + $0x28] sm:$0xff]   ;;  %s2389_s14 = scalar_lea.vmem %s2633_s7, %s1887_s11 }
  0x24   : > { %1972 = vmatprep.mubr.msk.bf16.mxu1 %vm608_vm0, %v2097_v4  ;;  %v2105_v10 = vld [vmem:[%s2352_s30] sm:$0xff]   ;;  %v2106_v11 = vld [vmem:[%s2352_s30 + $0x8] sm:$0xff]   ;;  %v2107_v12 = vld [vmem:[%s2352_s30 + $0x10] sm:$0xff]   ;;  %s433_s23 = sld [smem:[#allocation3 + %s2326_s0]] }
  0x25   : > { %v2102_v18 = vld [vmem:[%s2339_s22 + $0x68] sm:$0xff]   ;;  %v2095_v19 = vld [vmem:[%s2339_s22 + $0x30] sm:$0xff]   ;;  %v2096_v21 = vld [vmem:[%s2339_s22 + $0x38] sm:$0xff]   ;;  %s445_s27 = sld [smem:[#allocation3 + %s2326_s0]]  ;;  %s1771_s0 = sshll.u32 %s2637_s17, 3 }
  0x26   : > { %1951 = vmatpush3.bf16.msra.mxu0 %v2086_v2  ;;  %2073 = vmatpush3.bf16.msra.mxu1 %v2086_v2  ;;  %v2103_v20 = vld [vmem:[%s2339_s22 + $0x70] sm:$0xff]   ;;  %v2104_v22 = vld [vmem:[%s2339_s22 + $0x78] sm:$0xff]   ;;  %v2109_v24 = vld [vmem:[%s2389_s14] sm:$0xff]   ;;  %s411_s19 = sadd.s32 %s1763_s18, %s410_s1  ;;  %s2538_s12 = scalar_lea.vmem %s2635_s9, %s1771_s0 }
  0x27   : > { %1952 = vmatprep.subr.bf16.mxu0 %v2087_v3  ;;  %2070 = vmatprep.subr.bf16.mxu1 %v2087_v3  ;;  %v2108_v23 = vld [vmem:[%s2352_s30 + $0x18] sm:$0xff]   ;;  %v2110_v25 = vld [vmem:[%s2389_s14 + $0x8] sm:$0xff]   ;;  %v2111_v26 = vld [vmem:[%s2389_s14 + $0x10] sm:$0xff]   ;;  %p412_p12 = scmp.lt.s32.totalorder %s411_s19, 7 }
  0x29   : > { %s2645_s19 = smov (!%p412_p12, %s411_s19), 7 }
  0x2a   : > { %1953 = vmatpush3.bf16.msra.mxu0 %v2087_v3  ;;  %2074 = vmatpush3.bf16.msra.mxu1 %v2087_v3  ;;  %s414_s22 = scalar_lea.vmem %s2629_s3, %s2645_s19  ;;  %p434_p13 = scmp.lt.s32.totalorder %s433_s23, 1 }
  0x2b   : > { %1954 = vmatprep.subr.bf16.mxu0 %v2088_v5  ;;  %2071 = vmatprep.subr.bf16.mxu1 %v2088_v5  ;;  %v2398_v27 = vld [vmem:[%s414_s22] ss:$0 sm:$0xff]  ;;  %p446_p0 = scmp.lt.s32.totalorder %s445_s27, 1 }
  0x2c   : > { %s2647_s23 = smov (!%p434_p13, %s433_s23), 1 }
  0x2d   : > { %s436_s26 = scalar_lea.vmem %s2632_s6, %s2647_s23  ;;  %s2649_s27 = smov (!%p446_p0, %s445_s27), 1 }
  0x2e   : > { %1955 = vmatpush3.bf16.msra.mxu0 %v2088_v5  ;;  %2075 = vmatpush3.bf16.msra.mxu1 %v2088_v5  ;;  %s448_s30 = scalar_lea.vmem %s2634_s8, %s2649_s27 }
  0x2f   : > { %1988 = vmatprep.subr.bf16.mxu1 %v2105_v10  ;;  %2028 = vmatprep.subr.bf16.mxu0 %v2109_v24 }
  0x31   : > { %1957 = vmatmul.mubr.msk.bf16.vlgmr.msra.gmra.mrb[0].mxu0 %vm608_vm0, %v2090_v6  ;;  %1973 = vmatmul.mubr.msk.bf16.vlgmr.msra.gmra.mrb[0].mxu1 %vm608_vm0, %v2098_v8 }
  0x32   : > { %1960 = vmatprep.mubr.msk.bf16.mxu0 %vm608_vm0, %v2091_v7  ;;  %1976 = vmatprep.mubr.msk.bf16.mxu1 %vm608_vm0, %v2099_v9 }
  0x33   : > { %1989 = vmatpush3.bf16.msra.mxu1 %v2105_v10  ;;  %2029 = vmatpush3.bf16.msra.mxu0 %v2109_v24 }
  0x34   : > { %1990 = vmatprep.subr.bf16.mxu1 %v2106_v11  ;;  %2030 = vmatprep.subr.bf16.mxu0 %v2110_v25 }
  0x37   : > { %1991 = vmatpush3.bf16.msra.mxu1 %v2106_v11  ;;  %2031 = vmatpush3.bf16.msra.mxu0 %v2110_v25 }
  0x38   : > { %1992 = vmatprep.subr.bf16.mxu1 %v2107_v12  ;;  %2032 = vmatprep.subr.bf16.mxu0 %v2111_v26 }
  0x39   : > { %1961 = vmatmul.mubr.msk.bf16.gmra.mrb[4].mxu0 %vm608_vm0, %v2092_v13  ;;  %1977 = vmatmul.mubr.msk.bf16.gmra.mrb[4].mxu1 %vm608_vm0, %v2100_v14 }
  0x3a   : > { %1964 = vmatprep.mubr.msk.bf16.mxu0 %vm608_vm0, %v2093_v15  ;;  %1980 = vmatprep.mubr.msk.bf16.mxu1 %vm608_vm0, %v2101_v16 }
  0x3b   : > { %1993 = vmatpush3.bf16.msra.mxu1 %v2107_v12  ;;  %2033 = vmatpush3.bf16.msra.mxu0 %v2111_v26 }
  0x3c   : > { %1994 = vmatprep.subr.bf16.mxu1 %v2108_v23 }
  0x3f   : > { %1995 = vmatpush3.bf16.msra.mxu1 %v2108_v23 }
  0x41   : > { %1965 = vmatmul.mubr.msk.bf16.gmra.mrb[8].mxu0 %vm608_vm0, %v2094_v17  ;;  %1981 = vmatmul.mubr.msk.bf16.gmra.mrb[8].mxu1 %vm608_vm0, %v2102_v18 }
  0x42   : > { %1968 = vmatprep.mubr.msk.bf16.mxu0 %vm608_vm0, %v2095_v19  ;;  %1984 = vmatprep.mubr.msk.bf16.mxu1 %vm608_vm0, %v2103_v20 }
  0x49   : > { %1969 = vmatmul.mubr.msk.bf16.gmra.mrb[12].mxu0 %vm608_vm0, %v2096_v21  ;;  %1985 = vmatmul.mubr.msk.bf16.gmra.mrb[12].mxu1 %vm608_vm0, %v2104_v22 }
 0x104   : > { %v1958_v28 = vpop.f32.mrb[0].mxu0  ;;  %v1974_v29 = vpop.f32.mrb[0].mxu1 }
 0x105   : > { %v700_v30 = vadd.f32 %v1958_v28, %v2398_v27  ;;  %v691_v31 = vpop.f32.mrb[1].mxu0  ;;  %v764_v32 = vadd.f32 %v1974_v29, %v2398_v27  ;;  %v755_v33 = vpop.f32.mrb[1].mxu1 }
 0x106   : > { %v692_v34 = vadd.f32 %v2398_v27, %v691_v31  ;;  %v1959_v35 = vpop.f32.mrb[2].mxu0  ;;  %v756_v36 = vadd.f32 %v2398_v27, %v755_v33  ;;  %v1975_v37 = vpop.f32.mrb[2].mxu1 }
 0x107   : > { %v703_v38 = vadd.f32 %v1959_v35, %v2398_v27  ;;  %v694_v39 = vpop.f32.mrb[3].mxu0  ;;  %v836_v40 = vmax.f32 %v764_v32, 0.0  ;;  %v767_v41 = vadd.f32 %v1975_v37, %v2398_v27  ;;  %v758_v42 = vpop.f32.mrb[3].mxu1  ;;  %v820_v46 = vmax.f32 %v700_v30, 0.0 }
 0x108   : > { %v695_v43 = vadd.f32 %v2398_v27, %v694_v39  ;;  %v834_v44 = vmax.f32 %v756_v36, 0.0  ;;  %v759_v45 = vadd.f32 %v2398_v27, %v758_v42  ;;  %v818_v49 = vmax.f32 %v692_v34, 0.0 }
 0x109   : > { %v821_v47 = vmax.f32 %v703_v38, 0.0  ;;  %v837_v48 = vmax.f32 %v767_v41, 0.0 }
 0x10a   : > { %v819_v50 = vmax.f32 %v695_v43, 0.0  ;;  %v835_v51 = vmax.f32 %v759_v45, 0.0 }
 0x10b   : > { %v851_v52 = vpack.c.bf16 %v821_v47, %v820_v46  ;;  %v2408_v53 = vpack.c.bf16 %v837_v48, %v836_v40 }
 0x10c   : > { %v850_v54 = vpack.c.bf16 %v819_v50, %v818_v49  ;;  %v1962_v55 = vpop.f32.mrb[4].mxu0  ;;  %v2410_v56 = vpack.c.bf16 %v835_v51, %v834_v44  ;;  %v1978_v57 = vpop.f32.mrb[4].mxu1 }
 0x10d   : > { %v716_v58 = vadd.f32 %v1962_v55, %v2398_v27  ;;  %v707_v59 = vpop.f32.mrb[5].mxu0  ;;  %v780_v60 = vadd.f32 %v1978_v57, %v2398_v27  ;;  %v771_v61 = vpop.f32.mrb[5].mxu1 }
 0x10e   : > { %v708_v62 = vadd.f32 %v2398_v27, %v707_v59  ;;  %v1963_v63 = vpop.f32.mrb[6].mxu0  ;;  %1996 = vmatprep.mubr.msk.bf16.mxu1 %vm608_vm0, %v850_v54  ;;  %v772_v0 = vadd.f32 %v2398_v27, %v771_v61  ;;  %v1979_v1 = vpop.f32.mrb[6].mxu1 }
 0x10f   : > { %v719_v2 = vadd.f32 %v1963_v63, %v2398_v27  ;;  %v710_v3 = vpop.f32.mrb[7].mxu0  ;;  %1997 = vmatmul.mubr.msk.bf16.vlgmr.msra.gmra.mrb[16].mxu1 %vm608_vm0, %v851_v52  ;;  %v840_v4 = vmax.f32 %v780_v60, 0.0  ;;  %v783_v5 = vadd.f32 %v1979_v1, %v2398_v27  ;;  %v774_v6 = vpop.f32.mrb[7].mxu1  ;;  %v824_v10 = vmax.f32 %v716_v58, 0.0 }
 0x110   : > { %v711_v7 = vadd.f32 %v2398_v27, %v710_v3  ;;  %v838_v8 = vmax.f32 %v772_v0, 0.0  ;;  %v775_v9 = vadd.f32 %v2398_v27, %v774_v6  ;;  %v822_v13 = vmax.f32 %v708_v62, 0.0 }
 0x111   : > { %v825_v11 = vmax.f32 %v719_v2, 0.0  ;;  %v841_v12 = vmax.f32 %v783_v5, 0.0 }
 0x112   : > { %v823_v14 = vmax.f32 %v711_v7, 0.0  ;;  %v839_v15 = vmax.f32 %v775_v9, 0.0 }
 0x113   : > { %v853_v16 = vpack.c.bf16 %v825_v11, %v824_v10  ;;  %v2422_v17 = vpack.c.bf16 %v841_v12, %v840_v4 }
 0x114   : > { %v852_v18 = vpack.c.bf16 %v823_v14, %v822_v13  ;;  %v1966_v19 = vpop.f32.mrb[8].mxu0  ;;  %v2424_v20 = vpack.c.bf16 %v839_v15, %v838_v8  ;;  %v1982_v21 = vpop.f32.mrb[8].mxu1 }
 0x115   : > { %v732_v22 = vadd.f32 %v1966_v19, %v2398_v27  ;;  %v723_v23 = vpop.f32.mrb[9].mxu0  ;;  %v796_v24 = vadd.f32 %v1982_v21, %v2398_v27  ;;  %v787_v25 = vpop.f32.mrb[9].mxu1 }
 0x116   : > { %v724_v26 = vadd.f32 %v2398_v27, %v723_v23  ;;  %v1967_v28 = vpop.f32.mrb[10].mxu0  ;;  %2000 = vmatprep.mubr.msk.bf16.mxu1 %vm608_vm0, %v852_v18  ;;  %v788_v29 = vadd.f32 %v2398_v27, %v787_v25  ;;  %v1983_v30 = vpop.f32.mrb[10].mxu1 }
 0x117   : > { %v735_v31 = vadd.f32 %v1967_v28, %v2398_v27  ;;  %v726_v32 = vpop.f32.mrb[11].mxu0  ;;  %2001 = vmatmul.mubr.msk.bf16.gmra.mrb[20].mxu1 %vm608_vm0, %v853_v16  ;;  %v844_v33 = vmax.f32 %v796_v24, 0.0  ;;  %v799_v34 = vadd.f32 %v1983_v30, %v2398_v27  ;;  %v790_v35 = vpop.f32.mrb[11].mxu1  ;;  %v828_v39 = vmax.f32 %v732_v22, 0.0 }
 0x118   : > { %v727_v36 = vadd.f32 %v2398_v27, %v726_v32  ;;  %v842_v37 = vmax.f32 %v788_v29, 0.0  ;;  %v791_v38 = vadd.f32 %v2398_v27, %v790_v35  ;;  %v826_v42 = vmax.f32 %v724_v26, 0.0 }
 0x119   : > { %v829_v40 = vmax.f32 %v735_v31, 0.0  ;;  %v845_v41 = vmax.f32 %v799_v34, 0.0 }
 0x11a   : > { %v827_v43 = vmax.f32 %v727_v36, 0.0  ;;  %v843_v44 = vmax.f32 %v791_v38, 0.0 }
 0x11b   : > { %v855_v45 = vpack.c.bf16 %v829_v40, %v828_v39  ;;  %v863_v46 = vpack.c.bf16 %v845_v41, %v844_v33 }
 0x11c   : > { %v854_v47 = vpack.c.bf16 %v827_v43, %v826_v42  ;;  %v1970_v48 = vpop.f32.mrb[12].mxu0  ;;  %v862_v49 = vpack.c.bf16 %v843_v44, %v842_v37  ;;  %v1986_v50 = vpop.f32.mrb[12].mxu1 }
 0x11d   : > { %v748_v51 = vadd.f32 %v1970_v48, %v2398_v27  ;;  %v739_v52 = vpop.f32.mrb[13].mxu0  ;;  %v812_v54 = vadd.f32 %v1986_v50, %v2398_v27  ;;  %v803_v55 = vpop.f32.mrb[13].mxu1 }
 0x11e   : > { %v740_v57 = vadd.f32 %v2398_v27, %v739_v52  ;;  %v1971_v58 = vpop.f32.mrb[14].mxu0  ;;  %2004 = vmatprep.mubr.msk.bf16.mxu1 %vm608_vm0, %v854_v47  ;;  %v804_v59 = vadd.f32 %v2398_v27, %v803_v55  ;;  %v1987_v60 = vpop.f32.mrb[14].mxu1 }
 0x11f   : > { %v751_v61 = vadd.f32 %v1971_v58, %v2398_v27  ;;  %v742_v62 = vpop.f32.mrb[15].mxu0  ;;  %2005 = vmatmul.mubr.msk.bf16.gmra.mrb[24].mxu1 %vm608_vm0, %v855_v45  ;;  %v848_v63 = vmax.f32 %v812_v54, 0.0  ;;  %v815_v0 = vadd.f32 %v1987_v60, %v2398_v27  ;;  %v806_v1 = vpop.f32.mrb[15].mxu1  ;;  %v832_v5 = vmax.f32 %v748_v51, 0.0 }
 0x120   : > { %v743_v2 = vadd.f32 %v2398_v27, %v742_v62  ;;  %v846_v3 = vmax.f32 %v804_v59, 0.0  ;;  %v807_v4 = vadd.f32 %v2398_v27, %v806_v1  ;;  %v830_v8 = vmax.f32 %v740_v57, 0.0  ;;  %v2112_v27 = vld [vmem:[%s2389_s14 + $0x18] sm:$0xff]  }
 0x121   : > { %v833_v6 = vmax.f32 %v751_v61, 0.0  ;;  %v849_v7 = vmax.f32 %v815_v0, 0.0  ;;  %2034 = vmatprep.subr.bf16.mxu0 %v2112_v27 }
 0x122   : > { %v831_v9 = vmax.f32 %v743_v2, 0.0  ;;  %v847_v10 = vmax.f32 %v807_v4, 0.0  ;;  %2035 = vmatpush3.bf16.msra.mxu0 %v2112_v27 }
 0x123   : > { %v857_v11 = vpack.c.bf16 %v833_v6, %v832_v5  ;;  %v865_v12 = vpack.c.bf16 %v849_v7, %v848_v63 }
 0x124   : > { %v856_v13 = vpack.c.bf16 %v831_v9, %v830_v8  ;;  %v864_v14 = vpack.c.bf16 %v847_v10, %v846_v3 }
 0x126   : > { %2008 = vmatprep.mubr.msk.bf16.mxu1 %vm608_vm0, %v856_v13 }
 0x127   : > { %2009 = vmatmul.mubr.msk.bf16.gmra.mrb[28].mxu1 %vm608_vm0, %v857_v11 }
 0x128   : > { %2012 = vmatprep.mubr.msk.bf16.mxu1 %vm608_vm0, %v2410_v56 }
 0x12f   : > { %2013 = vmatmul.mubr.msk.bf16.gmra.mrb[32].mxu1 %vm608_vm0, %v2408_v53  ;;  %v2465_v53 = vld [vmem:[%s436_s26] ss:$0 sm:$0xff] }
 0x130   : > { %2016 = vmatprep.mubr.msk.bf16.mxu1 %vm608_vm0, %v2424_v20 }
 0x137   : > { %2017 = vmatmul.mubr.msk.bf16.gmra.mrb[36].mxu1 %vm608_vm0, %v2422_v17 }
 0x138   : > { %2020 = vmatprep.mubr.msk.bf16.mxu1 %vm608_vm0, %v862_v49 }
 0x13f   : > { %2021 = vmatmul.mubr.msk.bf16.gmra.mrb[40].mxu1 %vm608_vm0, %v863_v46 }
 0x140   : > { %2024 = vmatprep.mubr.msk.bf16.mxu1 %vm608_vm0, %v864_v14 }
 0x147   : > { %2025 = vmatmul.mubr.msk.bf16.gmra.mrb[44].mxu1 %vm608_vm0, %v865_v12 }
 0x1e2   : > { %v1998_v56 = vpop.f32.mrb[16].mxu1 }
 0x1e3   : > { %v996_v15 = vadd.f32 %v1998_v56, %v2465_v53  ;;  %v987_v16 = vpop.f32.mrb[17].mxu1 }
 0x1e4   : > { %v988_v17 = vadd.f32 %v2465_v53, %v987_v16  ;;  %v1999_v18 = vpop.f32.mrb[18].mxu1 }
 0x1e5   : > { %v999_v19 = vadd.f32 %v1999_v18, %v2465_v53  ;;  %v990_v20 = vpop.f32.mrb[19].mxu1  ;;  %v1116_v22 = vmax.f32 %v996_v15, 0.0 }
 0x1e6   : > { %v991_v21 = vadd.f32 %v2465_v53, %v990_v20  ;;  %v1114_v24 = vmax.f32 %v988_v17, 0.0 }
 0x1e7   : > { %v1117_v23 = vmax.f32 %v999_v19, 0.0 }
 0x1e8   : > { %v1115_v25 = vmax.f32 %v991_v21, 0.0 }
 0x1e9   : > { %v1147_v26 = vpack.c.bf16 %v1117_v23, %v1116_v22 }
 0x1ea   : > { %v1146_v28 = vpack.c.bf16 %v1115_v25, %v1114_v24  ;;  %v2002_v29 = vpop.f32.mrb[20].mxu1 }
 0x1eb   : > { %v1012_v30 = vadd.f32 %v2002_v29, %v2465_v53  ;;  %v1003_v31 = vpop.f32.mrb[21].mxu1 }
 0x1ec   : > { %v1004_v32 = vadd.f32 %v2465_v53, %v1003_v31  ;;  %v2003_v33 = vpop.f32.mrb[22].mxu1  ;;  %2036 = vmatprep.mubr.msk.bf16.mxu0 %vm608_vm0, %v1146_v28 }
 0x1ed   : > { %v1015_v34 = vadd.f32 %v2003_v33, %v2465_v53  ;;  %v1006_v35 = vpop.f32.mrb[23].mxu1  ;;  %2037 = vmatmul.mubr.msk.bf16.vlgmr.msra.gmra.mrb[16].mxu0 %vm608_vm0, %v1147_v26  ;;  %v1120_v37 = vmax.f32 %v1012_v30, 0.0 }
 0x1ee   : > { %v1007_v36 = vadd.f32 %v2465_v53, %v1006_v35  ;;  %v1118_v39 = vmax.f32 %v1004_v32, 0.0 }
 0x1ef   : > { %v1121_v38 = vmax.f32 %v1015_v34, 0.0 }
 0x1f0   : > { %v1119_v40 = vmax.f32 %v1007_v36, 0.0 }
 0x1f1   : > { %v1149_v41 = vpack.c.bf16 %v1121_v38, %v1120_v37 }
 0x1f2   : > { %v1148_v42 = vpack.c.bf16 %v1119_v40, %v1118_v39  ;;  %v2006_v43 = vpop.f32.mrb[24].mxu1 }
 0x1f3   : > { %v1028_v44 = vadd.f32 %v2006_v43, %v2465_v53  ;;  %v1019_v45 = vpop.f32.mrb[25].mxu1 }
 0x1f4   : > { %v1020_v46 = vadd.f32 %v2465_v53, %v1019_v45  ;;  %v2007_v47 = vpop.f32.mrb[26].mxu1  ;;  %2040 = vmatprep.mubr.msk.bf16.mxu0 %vm608_vm0, %v1148_v42 }
 0x1f5   : > { %v1031_v48 = vadd.f32 %v2007_v47, %v2465_v53  ;;  %v1022_v49 = vpop.f32.mrb[27].mxu1  ;;  %2041 = vmatmul.mubr.msk.bf16.gmra.mrb[20].mxu0 %vm608_vm0, %v1149_v41  ;;  %v1124_v51 = vmax.f32 %v1028_v44, 0.0 }
 0x1f6   : > { %v1023_v50 = vadd.f32 %v2465_v53, %v1022_v49  ;;  %v1122_v54 = vmax.f32 %v1020_v46, 0.0 }
 0x1f7   : > { %v1125_v52 = vmax.f32 %v1031_v48, 0.0 }
 0x1f8   : > { %v1123_v55 = vmax.f32 %v1023_v50, 0.0 }
 0x1f9   : > { %v1151_v57 = vpack.c.bf16 %v1125_v52, %v1124_v51 }
 0x1fa   : > { %v1150_v58 = vpack.c.bf16 %v1123_v55, %v1122_v54  ;;  %v2010_v59 = vpop.f32.mrb[28].mxu1 }
 0x1fb   : > { %v1044_v60 = vadd.f32 %v2010_v59, %v2465_v53  ;;  %v1035_v61 = vpop.f32.mrb[29].mxu1 }
 0x1fc   : > { %v1036_v62 = vadd.f32 %v2465_v53, %v1035_v61  ;;  %v2011_v63 = vpop.f32.mrb[30].mxu1  ;;  %2044 = vmatprep.mubr.msk.bf16.mxu0 %vm608_vm0, %v1150_v58 }
 0x1fd   : > { %v1047_v0 = vadd.f32 %v2011_v63, %v2465_v53  ;;  %v1038_v1 = vpop.f32.mrb[31].mxu1  ;;  %2045 = vmatmul.mubr.msk.bf16.gmra.mrb[24].mxu0 %vm608_vm0, %v1151_v57  ;;  %v1128_v3 = vmax.f32 %v1044_v60, 0.0 }
 0x1fe   : > { %v1039_v2 = vadd.f32 %v2465_v53, %v1038_v1  ;;  %v1126_v5 = vmax.f32 %v1036_v62, 0.0 }
 0x1ff   : > { %v1129_v4 = vmax.f32 %v1047_v0, 0.0 }
 0x200   : > { %v1127_v6 = vmax.f32 %v1039_v2, 0.0  ;;  %v2519_v2 = vld [vmem:[%s448_s30] ss:$0 sm:$0xff] }
 0x201   : > { %v1153_v7 = vpack.c.bf16 %v1129_v4, %v1128_v3 }
 0x202   : > { %v1152_v8 = vpack.c.bf16 %v1127_v6, %v1126_v5  ;;  %v2014_v9 = vpop.f32.mrb[32].mxu1 }
 0x203   : > { %v1060_v10 = vadd.f32 %v2014_v9, %v2465_v53  ;;  %v1051_v11 = vpop.f32.mrb[33].mxu1 }
 0x204   : > { %v1052_v12 = vadd.f32 %v2465_v53, %v1051_v11  ;;  %v2015_v13 = vpop.f32.mrb[34].mxu1  ;;  %2048 = vmatprep.mubr.msk.bf16.mxu0 %vm608_vm0, %v1152_v8 }
 0x205   : > { %v1063_v14 = vadd.f32 %v2015_v13, %v2465_v53  ;;  %v1054_v27 = vpop.f32.mrb[35].mxu1  ;;  %2049 = vmatmul.mubr.msk.bf16.gmra.mrb[28].mxu0 %vm608_vm0, %v1153_v7  ;;  %v1132_v15 = vmax.f32 %v1060_v10, 0.0 }
 0x206   : > { %v1055_v56 = vadd.f32 %v2465_v53, %v1054_v27  ;;  %v1130_v17 = vmax.f32 %v1052_v12, 0.0 }
 0x207   : > { %v1133_v16 = vmax.f32 %v1063_v14, 0.0 }
 0x208   : > { %v1131_v18 = vmax.f32 %v1055_v56, 0.0 }
 0x209   : > { %v1155_v19 = vpack.c.bf16 %v1133_v16, %v1132_v15 }
 0x20a   : > { %v1154_v20 = vpack.c.bf16 %v1131_v18, %v1130_v17  ;;  %v2018_v21 = vpop.f32.mrb[36].mxu1 }
 0x20b   : > { %v1076_v22 = vadd.f32 %v2018_v21, %v2465_v53  ;;  %v1067_v23 = vpop.f32.mrb[37].mxu1 }
 0x20c   : > { %v1068_v24 = vadd.f32 %v2465_v53, %v1067_v23  ;;  %v2019_v25 = vpop.f32.mrb[38].mxu1  ;;  %2052 = vmatprep.mubr.msk.bf16.mxu0 %vm608_vm0, %v1154_v20 }
 0x20d   : > { %v1079_v26 = vadd.f32 %v2019_v25, %v2465_v53  ;;  %v1070_v28 = vpop.f32.mrb[39].mxu1  ;;  %2053 = vmatmul.mubr.msk.bf16.gmra.mrb[32].mxu0 %vm608_vm0, %v1155_v19  ;;  %v1136_v30 = vmax.f32 %v1076_v22, 0.0 }
 0x20e   : > { %v1071_v29 = vadd.f32 %v2465_v53, %v1070_v28  ;;  %v1134_v32 = vmax.f32 %v1068_v24, 0.0 }
 0x20f   : > { %v1137_v31 = vmax.f32 %v1079_v26, 0.0 }
 0x210   : > { %v1135_v33 = vmax.f32 %v1071_v29, 0.0 }
 0x211   : > { %v1157_v34 = vpack.c.bf16 %v1137_v31, %v1136_v30 }
 0x212   : > { %v1156_v35 = vpack.c.bf16 %v1135_v33, %v1134_v32  ;;  %v2022_v36 = vpop.f32.mrb[40].mxu1 }
 0x213   : > { %v1092_v37 = vadd.f32 %v2022_v36, %v2465_v53  ;;  %v1083_v38 = vpop.f32.mrb[41].mxu1 }
 0x214   : > { %v1084_v39 = vadd.f32 %v2465_v53, %v1083_v38  ;;  %v2023_v40 = vpop.f32.mrb[42].mxu1  ;;  %2056 = vmatprep.mubr.msk.bf16.mxu0 %vm608_vm0, %v1156_v35 }
 0x215   : > { %v1095_v41 = vadd.f32 %v2023_v40, %v2465_v53  ;;  %v1086_v42 = vpop.f32.mrb[43].mxu1  ;;  %2057 = vmatmul.mubr.msk.bf16.gmra.mrb[36].mxu0 %vm608_vm0, %v1157_v34  ;;  %v1140_v44 = vmax.f32 %v1092_v37, 0.0 }
 0x216   : > { %v1087_v43 = vadd.f32 %v2465_v53, %v1086_v42  ;;  %v1138_v46 = vmax.f32 %v1084_v39, 0.0 }
 0x217   : > { %v1141_v45 = vmax.f32 %v1095_v41, 0.0 }
 0x218   : > { %v1139_v47 = vmax.f32 %v1087_v43, 0.0 }
 0x219   : > { %v1159_v48 = vpack.c.bf16 %v1141_v45, %v1140_v44 }
 0x21a   : > { %v1158_v49 = vpack.c.bf16 %v1139_v47, %v1138_v46  ;;  %v2026_v50 = vpop.f32.mrb[44].mxu1 }
 0x21b   : > { %v1108_v51 = vadd.f32 %v2026_v50, %v2465_v53  ;;  %v1099_v52 = vpop.f32.mrb[45].mxu1 }
 0x21c   : > { %v1100_v54 = vadd.f32 %v2465_v53, %v1099_v52  ;;  %v2027_v55 = vpop.f32.mrb[46].mxu1  ;;  %2060 = vmatprep.mubr.msk.bf16.mxu0 %vm608_vm0, %v1158_v49 }
 0x21d   : > { %v1111_v57 = vadd.f32 %v2027_v55, %v2465_v53  ;;  %v1102_v58 = vpop.f32.mrb[47].mxu1  ;;  %2061 = vmatmul.mubr.msk.bf16.gmra.mrb[40].mxu0 %vm608_vm0, %v1159_v48  ;;  %v1144_v60 = vmax.f32 %v1108_v51, 0.0 }
 0x21e   : > { %v1103_v59 = vadd.f32 %v2465_v53, %v1102_v58  ;;  %v1142_v62 = vmax.f32 %v1100_v54, 0.0 }
 0x21f   : > { %v1145_v61 = vmax.f32 %v1111_v57, 0.0 }
 0x220   : > { %v1143_v63 = vmax.f32 %v1103_v59, 0.0 }
 0x221   : > { %v1161_v0 = vpack.c.bf16 %v1145_v61, %v1144_v60 }
 0x222   : > { %v1160_v1 = vpack.c.bf16 %v1143_v63, %v1142_v62 }
 0x224   : > { %2064 = vmatprep.mubr.msk.bf16.mxu0 %vm608_vm0, %v1160_v1 }
 0x225   : > { %2065 = vmatmul.mubr.msk.bf16.gmra.mrb[44].mxu0 %vm608_vm0, %v1161_v0 }
 0x2c0   : > { %v2038_v53 = vpop.f32.mrb[16].mxu0 }
 0x2c1   : > { %v1292_v3 = vadd.f32 %v2038_v53, %v2519_v2  ;;  %v1283_v4 = vpop.f32.mrb[17].mxu0 }
 0x2c2   : > { %v1284_v5 = vadd.f32 %v2519_v2, %v1283_v4  ;;  %v2039_v6 = vpop.f32.mrb[18].mxu0 }
 0x2c3   : > { %v1853_v7 = vmul.f32 -1.442695, %v1292_v3  ;;  %v1295_v8 = vadd.f32 %v2039_v6, %v2519_v2  ;;  %v1286_v9 = vpop.f32.mrb[19].mxu0 }
 0x2c4   : > { %v1851_v10 = vmul.f32 -1.442695, %v1284_v5  ;;  %v1287_v11 = vadd.f32 %v2519_v2, %v1286_v9 }
 0x2c5   : > { %2113 = vpow2.f32 %v1853_v7  ;;  %v1854_v12 = vmul.f32 -1.442695, %v1295_v8 }
 0x2c6   : > { %2115 = vpow2.f32 %v1851_v10  ;;  %v1852_v13 = vmul.f32 -1.442695, %v1287_v11 }
 0x2c7   : > { %2117 = vpow2.f32 %v1854_v12 }
 0x2c8   : > { %2119 = vpow2.f32 %v1852_v13  ;;  %v2042_v14 = vpop.f32.mrb[20].mxu0 }
 0x2c9   : > { %v1308_v27 = vadd.f32 %v2042_v14, %v2519_v2  ;;  %v1299_v56 = vpop.f32.mrb[21].mxu0 }
 0x2ca   : > { %v1300_v15 = vadd.f32 %v2519_v2, %v1299_v56  ;;  %v2043_v16 = vpop.f32.mrb[22].mxu0 }
 0x2cb   : > { %v1857_v17 = vmul.f32 -1.442695, %v1308_v27  ;;  %v1311_v18 = vadd.f32 %v2043_v16, %v2519_v2  ;;  %v1302_v19 = vpop.f32.mrb[23].mxu0 }
 0x2cc   : > { %v1855_v20 = vmul.f32 -1.442695, %v1300_v15  ;;  %v1303_v21 = vadd.f32 %v2519_v2, %v1302_v19 }
 0x2cd   : > { %2121 = vpow2.f32 %v1857_v17  ;;  %v1858_v22 = vmul.f32 -1.442695, %v1311_v18 }
 0x2ce   : > { %2123 = vpow2.f32 %v1855_v20  ;;  %v1856_v23 = vmul.f32 -1.442695, %v1303_v21 }
 0x2cf   : > { %v2114_v24 = vpop.eup %2113  ;;  %2125 = vpow2.f32 %v1858_v22 }
 0x2d0   : > { %v2116_v25 = vpop.eup %2115  ;;  %v1508_v26 = vadd.f32 1.0, %v2114_v24  ;;  %2127 = vpow2.f32 %v1856_v23  ;;  %v2046_v28 = vpop.f32.mrb[24].mxu0 }
 0x2d1   : > { %v2118_v29 = vpop.eup %2117  ;;  %v1506_v30 = vadd.f32 1.0, %v2116_v25  ;;  %v1324_v31 = vadd.f32 %v2046_v28, %v2519_v2  ;;  %v1315_v32 = vpop.f32.mrb[25].mxu0 }
 0x2d2   : > { %v2120_v33 = vpop.eup %2119  ;;  %2129 = vrcp.f32 %v1508_v26  ;;  %v1509_v34 = vadd.f32 1.0, %v2118_v29  ;;  %v1316_v35 = vadd.f32 %v2519_v2, %v1315_v32  ;;  %v2047_v36 = vpop.f32.mrb[26].mxu0 }
 0x2d3   : > { %2131 = vrcp.f32 %v1506_v30  ;;  %v1507_v37 = vadd.f32 1.0, %v2120_v33  ;;  %v1861_v38 = vmul.f32 -1.442695, %v1324_v31  ;;  %v1327_v39 = vadd.f32 %v2047_v36, %v2519_v2  ;;  %v1318_v40 = vpop.f32.mrb[27].mxu0 }
 0x2d4   : > { %2133 = vrcp.f32 %v1509_v34  ;;  %v1859_v41 = vmul.f32 -1.442695, %v1316_v35  ;;  %v1319_v42 = vadd.f32 %v2519_v2, %v1318_v40 }
 0x2d5   : > { %2135 = vrcp.f32 %v1507_v37  ;;  %v1862_v43 = vmul.f32 -1.442695, %v1327_v39 }
 0x2d6   : > { %2137 = vpow2.f32 %v1861_v38  ;;  %v1860_v44 = vmul.f32 -1.442695, %v1319_v42 }
 0x2d7   : > { %v2122_v45 = vpop.eup %2121  ;;  %2139 = vpow2.f32 %v1859_v41 }
 0x2d8   : > { %v2124_v46 = vpop.eup %2123  ;;  %v1512_v47 = vadd.f32 1.0, %v2122_v45  ;;  %2141 = vpow2.f32 %v1862_v43  ;;  %v2050_v48 = vpop.f32.mrb[28].mxu0 }
 0x2d9   : > { %v2126_v49 = vpop.eup %2125  ;;  %v1510_v50 = vadd.f32 1.0, %v2124_v46  ;;  %2143 = vpow2.f32 %v1860_v44  ;;  %v1340_v51 = vadd.f32 %v2050_v48, %v2519_v2  ;;  %v1331_v52 = vpop.f32.mrb[29].mxu0 }
 0x2da   : > { %v2128_v54 = vpop.eup %2127  ;;  %2145 = vrcp.f32 %v1512_v47  ;;  %v1513_v55 = vadd.f32 1.0, %v2126_v49  ;;  %v1332_v57 = vadd.f32 %v2519_v2, %v1331_v52  ;;  %v2051_v58 = vpop.f32.mrb[30].mxu0 }
 0x2db   : > { %2147 = vrcp.f32 %v1510_v50  ;;  %v1511_v59 = vadd.f32 1.0, %v2128_v54  ;;  %v1865_v60 = vmul.f32 -1.442695, %v1340_v51  ;;  %v1343_v61 = vadd.f32 %v2051_v58, %v2519_v2  ;;  %v1334_v62 = vpop.f32.mrb[31].mxu0 }
 0x2dc   : > { %v2130_v63 = vpop.eup %2129  ;;  %2149 = vrcp.f32 %v1513_v55  ;;  %v1863_v0 = vmul.f32 -1.442695, %v1332_v57  ;;  %v1335_v1 = vadd.f32 %v2519_v2, %v1334_v62 }
 0x2dd   : > { %v2132_v53 = vpop.eup %2131  ;;  %1605 = vst.msk [vmem:[%s2538_s12 + $0x10] sm:$0xff] %vm1602_vm1, %v2130_v63  ;;  %2151 = vrcp.f32 %v1511_v59  ;;  %v1866_v3 = vmul.f32 -1.442695, %v1343_v61 }
 0x2de   : > { %v2134_v4 = vpop.eup %2133  ;;  %1603 = vst.msk [vmem:[%s2538_s12] sm:$0xff] %vm1602_vm1, %v2132_v53  ;;  %2153 = vpow2.f32 %v1865_v60  ;;  %v1864_v5 = vmul.f32 -1.442695, %v1335_v1 }
 0x2df   : > { %v2136_v6 = vpop.eup %2135  ;;  %1606 = vst.msk [vmem:[%s2538_s12 + $0x18] sm:$0xff] %vm1602_vm1, %v2134_v4  ;;  %2155 = vpow2.f32 %v1863_v0 }
 0x2e0   : > { %v2138_v7 = vpop.eup %2137  ;;  %1604 = vst.msk [vmem:[%s2538_s12 + $0x8] sm:$0xff] %vm1602_vm1, %v2136_v6  ;;  %2157 = vpow2.f32 %v1866_v3  ;;  %v2054_v8 = vpop.f32.mrb[32].mxu0 }
 0x2e1   : > { %v2140_v9 = vpop.eup %2139  ;;  %v1516_v10 = vadd.f32 1.0, %v2138_v7  ;;  %2159 = vpow2.f32 %v1864_v5  ;;  %v1356_v11 = vadd.f32 %v2054_v8, %v2519_v2  ;;  %v1347_v12 = vpop.f32.mrb[33].mxu0 }
 0x2e2   : > { %v2142_v13 = vpop.eup %2141  ;;  %v1514_v14 = vadd.f32 1.0, %v2140_v9  ;;  %v1348_v27 = vadd.f32 %v2519_v2, %v1347_v12  ;;  %v2055_v56 = vpop.f32.mrb[34].mxu0 }
 0x2e3   : > { %v2144_v15 = vpop.eup %2143  ;;  %2161 = vrcp.f32 %v1516_v10  ;;  %v1517_v16 = vadd.f32 1.0, %v2142_v13  ;;  %v1869_v17 = vmul.f32 -1.442695, %v1356_v11  ;;  %v1359_v18 = vadd.f32 %v2055_v56, %v2519_v2  ;;  %v1350_v19 = vpop.f32.mrb[35].mxu0 }
 0x2e4   : > { %v2146_v20 = vpop.eup %2145  ;;  %2163 = vrcp.f32 %v1514_v14  ;;  %v1515_v21 = vadd.f32 1.0, %v2144_v15  ;;  %v1867_v22 = vmul.f32 -1.442695, %v1348_v27  ;;  %v1351_v23 = vadd.f32 %v2519_v2, %v1350_v19 }
 0x2e5   : > { %v2148_v24 = vpop.eup %2147  ;;  %1609 = vst.msk [vmem:[%s2538_s12 + $0x30] sm:$0xff] %vm1602_vm1, %v2146_v20  ;;  %2165 = vrcp.f32 %v1517_v16  ;;  %v1870_v25 = vmul.f32 -1.442695, %v1359_v18 }
 0x2e6   : > { %v2150_v26 = vpop.eup %2149  ;;  %1607 = vst.msk [vmem:[%s2538_s12 + $0x20] sm:$0xff] %vm1602_vm1, %v2148_v24  ;;  %2167 = vrcp.f32 %v1515_v21  ;;  %v1868_v28 = vmul.f32 -1.442695, %v1351_v23 }
 0x2e7   : > { %v2152_v29 = vpop.eup %2151  ;;  %1610 = vst.msk [vmem:[%s2538_s12 + $0x38] sm:$0xff] %vm1602_vm1, %v2150_v26  ;;  %2169 = vpow2.f32 %v1869_v17 }
 0x2e8   : > { %v2154_v30 = vpop.eup %2153  ;;  %1608 = vst.msk [vmem:[%s2538_s12 + $0x28] sm:$0xff] %vm1602_vm1, %v2152_v29  ;;  %2171 = vpow2.f32 %v1867_v22  ;;  %v2058_v31 = vpop.f32.mrb[36].mxu0 }
 0x2e9   : > { %v2156_v32 = vpop.eup %2155  ;;  %v1520_v33 = vadd.f32 1.0, %v2154_v30  ;;  %2173 = vpow2.f32 %v1870_v25  ;;  %v1372_v34 = vadd.f32 %v2058_v31, %v2519_v2  ;;  %v1363_v35 = vpop.f32.mrb[37].mxu0 }
 0x2ea   : > { %v2158_v36 = vpop.eup %2157  ;;  %v1518_v37 = vadd.f32 1.0, %v2156_v32  ;;  %2175 = vpow2.f32 %v1868_v28  ;;  %v1364_v38 = vadd.f32 %v2519_v2, %v1363_v35  ;;  %v2059_v39 = vpop.f32.mrb[38].mxu0 }
 0x2eb   : > { %v2160_v40 = vpop.eup %2159  ;;  %2177 = vrcp.f32 %v1520_v33  ;;  %v1521_v41 = vadd.f32 1.0, %v2158_v36  ;;  %v1873_v42 = vmul.f32 -1.442695, %v1372_v34  ;;  %v1375_v43 = vadd.f32 %v2059_v39, %v2519_v2  ;;  %v1366_v44 = vpop.f32.mrb[39].mxu0 }
 0x2ec   : > { %2179 = vrcp.f32 %v1518_v37  ;;  %v1519_v45 = vadd.f32 1.0, %v2160_v40  ;;  %v1871_v46 = vmul.f32 -1.442695, %v1364_v38  ;;  %v1367_v47 = vadd.f32 %v2519_v2, %v1366_v44 }
 0x2ed   : > { %v2162_v48 = vpop.eup %2161  ;;  %2181 = vrcp.f32 %v1521_v41  ;;  %v1874_v49 = vmul.f32 -1.442695, %v1375_v43 }
 0x2ee   : > { %v2164_v50 = vpop.eup %2163  ;;  %1613 = vst.msk [vmem:[%s2538_s12 + $0x50] sm:$0xff] %vm1602_vm1, %v2162_v48  ;;  %2183 = vrcp.f32 %v1519_v45  ;;  %v1872_v51 = vmul.f32 -1.442695, %v1367_v47 }
 0x2ef   : > { %v2166_v52 = vpop.eup %2165  ;;  %1611 = vst.msk [vmem:[%s2538_s12 + $0x40] sm:$0xff] %vm1602_vm1, %v2164_v50  ;;  %2185 = vpow2.f32 %v1873_v42 }
 0x2f0   : > { %v2168_v54 = vpop.eup %2167  ;;  %1614 = vst.msk [vmem:[%s2538_s12 + $0x58] sm:$0xff] %vm1602_vm1, %v2166_v52  ;;  %2187 = vpow2.f32 %v1871_v46  ;;  %v2062_v55 = vpop.f32.mrb[40].mxu0 }
 0x2f1   : > { %v2170_v57 = vpop.eup %2169  ;;  %1612 = vst.msk [vmem:[%s2538_s12 + $0x48] sm:$0xff] %vm1602_vm1, %v2168_v54  ;;  %2189 = vpow2.f32 %v1874_v49  ;;  %v1388_v58 = vadd.f32 %v2062_v55, %v2519_v2  ;;  %v1379_v59 = vpop.f32.mrb[41].mxu0 }
 0x2f2   : > { %v2172_v60 = vpop.eup %2171  ;;  %v1524_v61 = vadd.f32 1.0, %v2170_v57  ;;  %2191 = vpow2.f32 %v1872_v51  ;;  %v1380_v62 = vadd.f32 %v2519_v2, %v1379_v59  ;;  %v2063_v63 = vpop.f32.mrb[42].mxu0 }
 0x2f3   : > { %v2174_v0 = vpop.eup %2173  ;;  %v1522_v1 = vadd.f32 1.0, %v2172_v60  ;;  %v1391_v53 = vadd.f32 %v2063_v63, %v2519_v2  ;;  %v1382_v3 = vpop.f32.mrb[43].mxu0  ;;  %v1877_v6 = vmul.f32 -1.442695, %v1388_v58 }
 0x2f4   : > { %v2176_v4 = vpop.eup %2175  ;;  %2193 = vrcp.f32 %v1524_v61  ;;  %v1525_v5 = vadd.f32 1.0, %v2174_v0  ;;  %v1383_v7 = vadd.f32 %v2519_v2, %v1382_v3  ;;  %v1875_v10 = vmul.f32 -1.442695, %v1380_v62 }
 0x2f5   : > { %v2178_v8 = vpop.eup %2177  ;;  %2195 = vrcp.f32 %v1522_v1  ;;  %v1523_v9 = vadd.f32 1.0, %v2176_v4  ;;  %v1878_v12 = vmul.f32 -1.442695, %v1391_v53 }
 0x2f6   : > { %v2180_v11 = vpop.eup %2179  ;;  %1617 = vst.msk [vmem:[%s2538_s12 + $0x70] sm:$0xff] %vm1602_vm1, %v2178_v8  ;;  %2197 = vrcp.f32 %v1525_v5  ;;  %v1876_v14 = vmul.f32 -1.442695, %v1383_v7 }
 0x2f7   : > { %v2182_v13 = vpop.eup %2181  ;;  %1615 = vst.msk [vmem:[%s2538_s12 + $0x60] sm:$0xff] %vm1602_vm1, %v2180_v11  ;;  %2199 = vrcp.f32 %v1523_v9 }
 0x2f8   : > { %v2184_v27 = vpop.eup %2183  ;;  %1618 = vst.msk [vmem:[%s2538_s12 + $0x78] sm:$0xff] %vm1602_vm1, %v2182_v13  ;;  %2201 = vpow2.f32 %v1877_v6  ;;  %v2066_v56 = vpop.f32.mrb[44].mxu0 }
 0x2f9   : > { %v2186_v15 = vpop.eup %2185  ;;  %1616 = vst.msk [vmem:[%s2538_s12 + $0x68] sm:$0xff] %vm1602_vm1, %v2184_v27  ;;  %2203 = vpow2.f32 %v1875_v10  ;;  %v1404_v16 = vadd.f32 %v2066_v56, %v2519_v2  ;;  %v1395_v17 = vpop.f32.mrb[45].mxu0 }
 0x2fa   : > { %v2188_v18 = vpop.eup %2187  ;;  %v1528_v19 = vadd.f32 1.0, %v2186_v15  ;;  %2205 = vpow2.f32 %v1878_v12  ;;  %v1396_v20 = vadd.f32 %v2519_v2, %v1395_v17  ;;  %v2067_v21 = vpop.f32.mrb[46].mxu0 }
 0x2fb   : > { %v2190_v22 = vpop.eup %2189  ;;  %v1526_v23 = vadd.f32 1.0, %v2188_v18  ;;  %2207 = vpow2.f32 %v1876_v14  ;;  %v1407_v24 = vadd.f32 %v2067_v21, %v2519_v2  ;;  %v1398_v25 = vpop.f32.mrb[47].mxu0  ;;  %v1881_v29 = vmul.f32 -1.442695, %v1404_v16 }
 0x2fc   : > { %v2192_v26 = vpop.eup %2191  ;;  %2209 = vrcp.f32 %v1528_v19  ;;  %v1529_v28 = vadd.f32 1.0, %v2190_v22  ;;  %v1399_v30 = vadd.f32 %v2519_v2, %v1398_v25  ;;  %v1879_v32 = vmul.f32 -1.442695, %v1396_v20 }
 0x2fd   : > { %2211 = vrcp.f32 %v1526_v23  ;;  %v1527_v31 = vadd.f32 1.0, %v2192_v26  ;;  %v1882_v34 = vmul.f32 -1.442695, %v1407_v24 }
 0x2fe   : > { %v2194_v33 = vpop.eup %2193  ;;  %2213 = vrcp.f32 %v1529_v28  ;;  %v1880_v36 = vmul.f32 -1.442695, %v1399_v30 }
 0x2ff   : > { %v2196_v35 = vpop.eup %2195  ;;  %1621 = vst.msk [vmem:[%s2538_s12 + $0x90] sm:$0xff] %vm1602_vm1, %v2194_v33  ;;  %2215 = vrcp.f32 %v1527_v31 }
 0x300   : > { %v2198_v37 = vpop.eup %2197  ;;  %1619 = vst.msk [vmem:[%s2538_s12 + $0x80] sm:$0xff] %vm1602_vm1, %v2196_v35  ;;  %2217 = vpow2.f32 %v1881_v29 }
 0x301   : > { %v2200_v38 = vpop.eup %2199  ;;  %1622 = vst.msk [vmem:[%s2538_s12 + $0x98] sm:$0xff] %vm1602_vm1, %v2198_v37  ;;  %2219 = vpow2.f32 %v1879_v32 }
 0x302   : > { %v2202_v2 = vpop.eup %2201  ;;  %1620 = vst.msk [vmem:[%s2538_s12 + $0x88] sm:$0xff] %vm1602_vm1, %v2200_v38  ;;  %2221 = vpow2.f32 %v1882_v34 }
 0x303   : > { %v2204_v39 = vpop.eup %2203  ;;  %v1532_v40 = vadd.f32 1.0, %v2202_v2  ;;  %2223 = vpow2.f32 %v1880_v36 }
 0x304   : > { %v2206_v41 = vpop.eup %2205  ;;  %v1530_v42 = vadd.f32 1.0, %v2204_v39 }
 0x305   : > { %v2208_v43 = vpop.eup %2207  ;;  %2225 = vrcp.f32 %v1532_v40  ;;  %v1533_v44 = vadd.f32 1.0, %v2206_v41 }
 0x306   : > { %v2210_v45 = vpop.eup %2209  ;;  %2227 = vrcp.f32 %v1530_v42  ;;  %v1531_v46 = vadd.f32 1.0, %v2208_v43 }
 0x307   : > { %v2212_v47 = vpop.eup %2211  ;;  %1625 = vst.msk [vmem:[%s2538_s12 + $0xb0] sm:$0xff] %vm1602_vm1, %v2210_v45  ;;  %2229 = vrcp.f32 %v1533_v44 }
 0x308   : > { %v2214_v48 = vpop.eup %2213  ;;  %1623 = vst.msk [vmem:[%s2538_s12 + $0xa0] sm:$0xff] %vm1602_vm1, %v2212_v47  ;;  %2231 = vrcp.f32 %v1531_v46 }
 0x309   : > { %v2216_v49 = vpop.eup %2215  ;;  %1626 = vst.msk [vmem:[%s2538_s12 + $0xb8] sm:$0xff] %vm1602_vm1, %v2214_v48 }
 0x30a   : > { %v2218_v50 = vpop.eup %2217  ;;  %1624 = vst.msk [vmem:[%s2538_s12 + $0xa8] sm:$0xff] %vm1602_vm1, %v2216_v49 }
 0x30b   : > { %v2220_v51 = vpop.eup %2219  ;;  %v1536_v52 = vadd.f32 1.0, %v2218_v50 }
 0x30c   : > { %v2222_v54 = vpop.eup %2221  ;;  %v1534_v55 = vadd.f32 1.0, %v2220_v51 }
 0x30d   : > { %v2224_v57 = vpop.eup %2223  ;;  %2233 = vrcp.f32 %v1536_v52  ;;  %v1537_v58 = vadd.f32 1.0, %v2222_v54 }
 0x30e   : > { %2235 = vrcp.f32 %v1534_v55  ;;  %v1535_v59 = vadd.f32 1.0, %v2224_v57 }
 0x30f   : > { %v2226_v60 = vpop.eup %2225  ;;  %2237 = vrcp.f32 %v1537_v58 }
 0x310   : > { %v2228_v61 = vpop.eup %2227  ;;  %1629 = vst.msk [vmem:[%s2538_s12 + $0xd0] sm:$0xff] %vm1602_vm1, %v2226_v60  ;;  %2239 = vrcp.f32 %v1535_v59 }
 0x311   : > { %v2230_v62 = vpop.eup %2229  ;;  %1627 = vst.msk [vmem:[%s2538_s12 + $0xc0] sm:$0xff] %vm1602_vm1, %v2228_v61 }
 0x312   : > { %v2232_v63 = vpop.eup %2231  ;;  %1630 = vst.msk [vmem:[%s2538_s12 + $0xd8] sm:$0xff] %vm1602_vm1, %v2230_v62 }
 0x313   : > { %1628 = vst.msk [vmem:[%s2538_s12 + $0xc8] sm:$0xff] %vm1602_vm1, %v2232_v63 }
 0x317   : > { %v2234_v0 = vpop.eup %2233 }
 0x318   : > { %v2236_v1 = vpop.eup %2235  ;;  %1633 = vst.msk [vmem:[%s2538_s12 + $0xf0] sm:$0xff] %vm1602_vm1, %v2234_v0 }
 0x319   : > { %v2238_v53 = vpop.eup %2237  ;;  %1631 = vst.msk [vmem:[%s2538_s12 + $0xe0] sm:$0xff] %vm1602_vm1, %v2236_v1 }
 0x31a   : > { %v2240_v3 = vpop.eup %2239  ;;  %1634 = vst.msk [vmem:[%s2538_s12 + $0xf8] sm:$0xff] %vm1602_vm1, %v2238_v53 }
 0x31b   : > { %1632 = vst.msk [vmem:[%s2538_s12 + $0xe8] sm:$0xff] %vm1602_vm1, %v2240_v3 }
 0x31c PF: > { %s26_s16 = sadd.s32 1, %s2261_s16  }
 0x31d   : > { %p23_p1 = scmp.ge.s32.totalorder %s26_s16, 4  }
 0x31f   :  { %25 = sbr.rel (!%p23_p1) target bundleno = 16 (0x10), region = 96 }

</bundles_post_ra>
